<compile_context>
chip_gen: v5e
topology: v5e:2x2
jax: 0.10.0
libtpu: 0.0.40
codegen_flags: <defaults>
</compile_context>

<pallas_src>
import functools

import jax
import jax.numpy as jnp
from jax.experimental import pallas as pl
from jax.experimental.pallas import tpu as pltpu

_LANE = 128
_SUBLANE = 8


def _round_up(x, m):
    return ((x + m - 1) // m) * m


def _divisor_tile(dim, base, cap):
    """Largest multiple of `base` that divides `dim` and is <= max(cap, base)."""
    cap = max(cap, base)
    best = base
    t = base
    while t <= min(dim, cap):
        if dim % t == 0:
            best = t
        t += base
    return best


@functools.lru_cache(maxsize=1)
def _vmem_budgets():
    """(vmem_limit_bytes, fused_budget_bytes), device-aware."""
    cap = None
    try:
        info = pltpu.get_tpu_info()
        cap = getattr(info, "vmem_capacity_bytes", None)
    except Exception:
        cap = None
    if cap is None:
        cap = 64 * 1024 * 1024                       # conservative (v7x-sized)
    if cap >= 96 * 1024 * 1024:                      # v5e / v6e: 128 MiB physical
        return 100 * 1024 * 1024, 96 * 1024 * 1024
    return 44 * 1024 * 1024, 40 * 1024 * 1024        # v7x: 64 MiB physical


def _apply_activation(y, name):
    if name is None:
        return y
    name = name.lower() if isinstance(name, str) else name
    if name == 'relu':
        return jnp.maximum(y, 0.0)
    if name == 'gelu':
        return jax.nn.gelu(y)
    if name == 'tanh':
        return jnp.tanh(y)
    if name == 'sigmoid':
        return jax.nn.sigmoid(y)
    # TODO(synk): other torch activation classes are not mapped; identity fallback.
    return y


_TRANSCENDENTAL_ACTS = ('gelu', 'tanh', 'sigmoid')


# ---------------------------------------------------------------------------
# Kernel 1: whole stack fused into a single pallas_call (weights VMEM-resident)
# ---------------------------------------------------------------------------
def _fused_stack_kernel(*refs, meta):
    # refs = (x_ref, <wt_ref[, b_ref]> per layer ..., o_ref)
    x_ref = refs[0]
    o_ref = refs[-1]
    prefs = refs[1:-1]

    y = x_ref[...]                       # already in compute dtype (bf16) -> no cast
    idx = 0
    for has_bias, act in meta:           # static Python loop (trace time)
        wt = prefs[idx][...]
        idx += 1
        y = jnp.dot(y.astype(wt.dtype), wt, preferred_element_type=jnp.float32)
        if has_bias:
            y = y + prefs[idx][...].astype(jnp.float32)
            idx += 1
        y = _apply_activation(y, act)
    o_ref[...] = y.astype(o_ref.dtype)


def _fused_call(x_pad, params, tm, out_dtype, vmem_limit, buffer_weights):
    m_pad, k0_pad = x_pad.shape
    n_out_pad = params[-1][0].shape[1]
    meta = tuple((b is not None, act) for (_, b, act) in params)

    # Grid-invariant operands do not need double-buffering.
    w_kwargs = dict(pipeline_mode=pl.Buffered(1)) if buffer_weights else {}

    in_specs = [pl.BlockSpec((tm, k0_pad), lambda i: (i, 0))]
    operands = [x_pad]
    flops = 0
    transcend = 0
    bytes_accessed = (x_pad.size * x_pad.dtype.itemsize
                      + m_pad * n_out_pad * jnp.dtype(out_dtype).itemsize)
    for wt, b, act in params:
        in_specs.append(pl.BlockSpec(wt.shape, lambda i: (0, 0), **w_kwargs))
        operands.append(wt)
        flops += 2 * m_pad * wt.shape[0] * wt.shape[1]
        if act in _TRANSCENDENTAL_ACTS:
            transcend += m_pad * wt.shape[1]
        bytes_accessed += wt.size * wt.dtype.itemsize
        if b is not None:
            in_specs.append(pl.BlockSpec(b.shape, lambda i: (0, 0), **w_kwargs))
            operands.append(b)
            bytes_accessed += b.size * b.dtype.itemsize

    kernel = functools.partial(_fused_stack_kernel, meta=meta)
    return pl.pallas_call(
        kernel,
        out_shape=jax.ShapeDtypeStruct((m_pad, n_out_pad), out_dtype),
        grid=(m_pad // tm,),
        in_specs=in_specs,
        out_specs=pl.BlockSpec((tm, n_out_pad), lambda i: (i, 0)),
        compiler_params=pltpu.CompilerParams(
            dimension_semantics=("parallel",),
            vmem_limit_bytes=vmem_limit),
        cost_estimate=pl.CostEstimate(flops=flops, transcendentals=transcend,
                                      bytes_accessed=bytes_accessed),
    )(*operands)


def _fused_vmem_ok(params, tm, k0_pad, budget):
    # Weights counted once (Buffered(1), grid-invariant).
    w_bytes = 0
    for wt, b, _ in params:
        w_bytes += wt.size * wt.dtype.itemsize
        if b is not None:
            w_bytes += b.size * b.dtype.itemsize
    widths = [k0_pad] + [wt.shape[1] for (wt, _, _) in params]
    act_bytes = 3 * tm * max(widths) * 4                       # live f32 activations
    in_dtype = params[0][0].dtype.itemsize
    io_bytes = 2 * tm * k0_pad * in_dtype + 2 * tm * widths[-1] * 4
    return (w_bytes + act_bytes + io_bytes) <= budget


def _pick_fused_tm(M, m_align, params, k0_pad, fused_budget):
    m_pad0 = _round_up(max(M, 1), m_align)
    if m_pad0 <= m_align:
        tm = m_pad0
    else:
        # >=2 grid steps so v7x's two TensorCores both get batch tiles; cap tm ~512.
        n_tiles = max(2, pl.cdiv(m_pad0, 512))
        tm = _round_up(pl.cdiv(m_pad0, n_tiles), m_align)
    # Shrink tm until the fused working set fits the budget (or bottoms out).
    while tm > m_align and not _fused_vmem_ok(params, tm, k0_pad, fused_budget):
        tm = max(m_align, _round_up(tm // 2, m_align))
    m_pad = _round_up(max(M, 1), tm)
    return tm, m_pad


# ---------------------------------------------------------------------------
# Kernel 2: tiled/pipelined single linear layer (fallback for large stacks)
# ---------------------------------------------------------------------------
def _tiled_linear_kernel(*refs, has_bias, act):
    # refs = (x_ref, wt_ref, [b_ref,] o_ref, acc_ref)
    x_ref, wt_ref = refs[0], refs[1]
    b_ref = refs[2] if has_bias else None
    o_ref = refs[3] if has_bias else refs[2]
    acc_ref = refs[-1]
    k = pl.program_id(2)

    @pl.when(k == 0)
    def _():
        acc_ref[...] = jnp.zeros_like(acc_ref)

    wt = wt_ref[...]
    acc_ref[...] += jnp.dot(x_ref[...].astype(wt.dtype), wt,
                            preferred_element_type=jnp.float32)

    @pl.when(k == pl.num_programs(2) - 1)
    def _():
        y = acc_ref[...]
        if has_bias:
            y = y + b_ref[...].astype(jnp.float32)
        y = _apply_activation(y, act)
        o_ref[...] = y.astype(o_ref.dtype)


def _tiled_linear(x_pad, wt, b, act, out_dtype, vmem_limit):
    m_pad, k_pad = x_pad.shape
    _, n_pad = wt.shape
    has_bias = b is not None
    out_itemsize = jnp.dtype(out_dtype).itemsize
    m_align = 16 if x_pad.dtype == jnp.dtype(jnp.bfloat16) else _SUBLANE
    step_budget = min(vmem_limit - 4 * 1024 * 1024, 32 * 1024 * 1024)

    def footprint(tm, tn, tk):
        fb = 2 * tm * tk * x_pad.dtype.itemsize       # x tile (double-buffered)
        fb += 2 * tk * tn * wt.dtype.itemsize         # weight tile (double-buffered)
        fb += 2 * tm * tn * out_itemsize              # output tile (double-buffered)
        fb += tm * tn * 4                             # f32 accumulator scratch
        if has_bias:
            fb += 2 * tn * b.dtype.itemsize
        return fb

    tm = _divisor_tile(m_pad, m_align, 512)
    tk = _divisor_tile(k_pad, _LANE, 1024)
    # Full-N tile when it fits: weights stream exactly once per M tile and the
    # x tile is never re-fetched across j.
    tn = n_pad if footprint(tm, n_pad, tk) <= step_budget \
        else _divisor_tile(n_pad, _LANE, 512)
    while footprint(tm, tn, tk) > step_budget and tk > _LANE:
        tk = _divisor_tile(k_pad, _LANE, tk - _LANE)
    while footprint(tm, tn, tk) > step_budget and tn > _LANE:
        tn = _divisor_tile(n_pad, _LANE, tn - _LANE)
    while footprint(tm, tn, tk) > step_budget and tm > m_align:
        tm = _divisor_tile(m_pad, m_align, tm - m_align)

    in_specs = [pl.BlockSpec((tm, tk), lambda i, j, k: (i, k)),
                pl.BlockSpec((tk, tn), lambda i, j, k: (k, j))]
    operands = [x_pad, wt]
    if has_bias:
        in_specs.append(pl.BlockSpec((1, tn), lambda i, j, k: (0, j)))
        operands.append(b)

    flops = 2 * m_pad * k_pad * n_pad
    transcend = m_pad * n_pad if act in _TRANSCENDENTAL_ACTS else 0
    bytes_accessed = (x_pad.size * x_pad.dtype.itemsize
                      + wt.size * wt.dtype.itemsize
                      + m_pad * n_pad * out_itemsize
                      + (b.size * b.dtype.itemsize if has_bias else 0))

    kernel = functools.partial(_tiled_linear_kernel, has_bias=has_bias, act=act)
    return pl.pallas_call(
        kernel,
        out_shape=jax.ShapeDtypeStruct((m_pad, n_pad), out_dtype),
        grid=(m_pad // tm, n_pad // tn, k_pad // tk),
        in_specs=in_specs,
        out_specs=pl.BlockSpec((tm, tn), lambda i, j, k: (i, j)),
        scratch_shapes=[pltpu.VMEM((tm, tn), jnp.float32)],
        compiler_params=pltpu.CompilerParams(
            dimension_semantics=("parallel", "parallel", "arbitrary"),
            vmem_limit_bytes=vmem_limit),
        cost_estimate=pl.CostEstimate(flops=flops, transcendentals=transcend,
                                      bytes_accessed=bytes_accessed),
    )(*operands)


# ---------------------------------------------------------------------------
# StackedLinear: build params from descriptors (mirrors __init__), then forward
# ---------------------------------------------------------------------------
def _torch_linear_init(key, in_features, out_features, bias):
    """Deterministic init matching torch.nn.Linear's U(-1/sqrt(in), 1/sqrt(in))."""
    kw, kb = jax.random.split(key)
    bound = 1.0 / jnp.sqrt(jnp.float32(in_features))
    w = jax.random.uniform(kw, (out_features, in_features), jnp.float32,
                           minval=-bound, maxval=bound)
    b = None
    if bias:
        b = jax.random.uniform(kb, (out_features,), jnp.float32,
                               minval=-bound, maxval=bound)
    return w, b


def build_stacked_linear(layer_descriptors, key, compute_dtype=jnp.bfloat16):
    """Builds kernel-ready params: Wt pre-transposed + zero-padded to (K_pad, N_pad),
    cast to compute_dtype (bf16 by default: native MXU dtype, half the DMA bytes).
    Accumulation / bias / activation stay f32."""
    raw = []      # (w (N,K) f32, b (N,) f32 or None, act) -- for the reference
    params = []   # (wt_pad (K_pad,N_pad) compute_dtype, b_pad (1,N_pad) f32 or None, act)
    in_feat_first = None
    out_feat_last = None
    prev_out_features = 1
    for cur_descriptor in layer_descriptors:
        if not isinstance(cur_descriptor, dict):
            continue
        nof_layers = cur_descriptor.get('nof_layers', 1)
        in_features = cur_descriptor.get('in_features', prev_out_features)
        out_features = cur_descriptor.get('out_features', 1)
        bias = cur_descriptor.get('bias', True)
        activation = cur_descriptor.get('activation', 'relu')  # torch default: nn.ReLU
        # dropout_p is identity in eval mode.  TODO(synk): training-mode dropout.
        cur_in_features = in_features
        for _ in range(nof_layers):
            key, sub = jax.random.split(key)
            w, b = _torch_linear_init(sub, cur_in_features, out_features, bias)
            raw.append((w, b, activation))

            k_pad = _round_up(cur_in_features, _LANE)
            n_pad = _round_up(out_features, _LANE)
            wt_pad = jnp.zeros((k_pad, n_pad), jnp.float32)
            wt_pad = wt_pad.at[:cur_in_features, :out_features].set(w.T)
            wt_pad = wt_pad.astype(compute_dtype)
            b_pad = None
            if b is not None:
                b_pad = jnp.zeros((1, n_pad), jnp.float32).at[0, :out_features].set(b)
            params.append((wt_pad, b_pad, activation))

            if in_feat_first is None:
                in_feat_first = cur_in_features
            out_feat_last = out_features
            cur_in_features = out_features
        prev_out_features = out_features
    return {'params': params, 'raw': raw, 'compute_dtype': compute_dtype,
            'in_features': in_feat_first, 'out_features': out_feat_last}


def stacked_linear_forward(x, stack, *, force_tiled=False):
    params = stack['params']
    if not params:
        return x                                   # nn.Identity
    M, K = x.shape
    assert K == stack['in_features'], (K, stack['in_features'])
    compute_dtype = stack['compute_dtype']
    k0_pad = params[0][0].shape[0]
    n_out = stack['out_features']

    m_align = 16 if jnp.dtype(compute_dtype) == jnp.dtype(jnp.bfloat16) else _SUBLANE
    vmem_limit, fused_budget = _vmem_budgets()
    tm, m_pad = _pick_fused_tm(M, m_align, params, k0_pad, fused_budget)

    x_pad = jnp.zeros((m_pad, k0_pad), compute_dtype).at[:M, :K].set(
        x.astype(compute_dtype))

    y_pad = None
    if (not force_tiled) and _fused_vmem_ok(params, tm, k0_pad, fused_budget):
        # First attempt single-buffered (grid-invariant) weights; fall back to
        # default pipelining if the running JAX rejects pipeline_mode=Buffered(1).
        for buffer_weights in (True, False):
            try:
                y_pad = _fused_call(x_pad, params, tm, x.dtype, vmem_limit,
                                    buffer_weights)
                break
            except Exception:
                y_pad = None

    if y_pad is None:
        # Per-layer tiled fallback; intermediates stay in compute_dtype (bf16)
        # to halve HBM round-trip traffic, final layer emits the input dtype.
        y_pad = x_pad
        for li, (wt, b, act) in enumerate(params):
            layer_out_dtype = x.dtype if li == len(params) - 1 else compute_dtype
            y_pad = _tiled_linear(y_pad, wt, b, act, layer_out_dtype, vmem_limit)

    return y_pad[:M, :n_out]


def stacked_linear_reference(x, stack):
    y = x
    for w, b, act in stack['raw']:
        y = jnp.matmul(y, w.T, precision=jax.lax.Precision.HIGHEST)
        if b is not None:
            y = y + b
        y = _apply_activation(y, act)
    return y


# ---------------------------------------------------------------------------
if __name__ == "__main__":
    key = jax.random.PRNGKey(0)
    kx1, kp1, kx2, kp2 = jax.random.split(key, 4)

    # ---- Test 1: small stack -> single fused kernel path ----
    layer_descriptors = [
        {'nof_layers': 2, 'in_features': 32, 'out_features': 64,
         'bias': True, 'activation': 'relu'},
        {'nof_layers': 1, 'out_features': 16, 'bias': True, 'activation': None},
    ]
    stack = build_stacked_linear(layer_descriptors, kp1)
    batch = 8
    x = jax.random.normal(kx1, (batch, 32), jnp.float32)

    y = jax.block_until_ready(stacked_linear_forward(x, stack))
    y_ref = stacked_linear_reference(x, stack)
    assert y.shape == (batch, 16), y.shape
    # bf16 operands vs f32 reference -> slightly looser tolerance than pure f32.
    assert jnp.allclose(y, y_ref, atol=5e-2, rtol=5e-2), "fused path mismatch"

    # ---- Test 2: tiled per-layer fallback path (forced, exercises K-reduction grid) ----
    layer_descriptors2 = [
        {'nof_layers': 1, 'in_features': 256, 'out_features': 384,
         'bias': True, 'activation': 'relu'},
        {'nof_layers': 1, 'out_features': 192, 'bias': False, 'activation': None},
    ]
    stack2 = build_stacked_linear(layer_descriptors2, kp2)
    x2 = jax.random.normal(kx2, (256, 256), jnp.float32)

    y2 = jax.block_until_ready(stacked_linear_forward(x2, stack2, force_tiled=True))
    y2_ref = stacked_linear_reference(x2, stack2)
    assert y2.shape == (256, 192), y2.shape
    assert jnp.allclose(y2, y2_ref, atol=5e-2, rtol=5e-2), "tiled path mismatch"

    print("KERNEL_OK")
</pallas_src>

<mosaic_0001>
module attributes {stable_mosaic.version = 11 : i64} {
  func.func @_fused_stack_kernel(%arg0: i32, %arg1: memref<16x128xbf16, #tpu.memory_space<vmem>>, %arg2: memref<128x128xbf16, #tpu.memory_space<vmem>>, %arg3: memref<1x128xf32, #tpu.memory_space<vmem>>, %arg4: memref<128x128xbf16, #tpu.memory_space<vmem>>, %arg5: memref<1x128xf32, #tpu.memory_space<vmem>>, %arg6: memref<128x128xbf16, #tpu.memory_space<vmem>>, %arg7: memref<1x128xf32, #tpu.memory_space<vmem>>, %arg8: memref<16x128xf32, #tpu.memory_space<vmem>>) attributes {dimension_semantics = [#tpu.dimension_semantics<parallel>], iteration_bounds = array<i64: 1>, scalar_prefetch = 0 : i64, scratch_operands = 0 : i64, tpu.core_type = #tpu.core_type<tc>, window_params = [{transform_indices = @transform_0, window_bounds = array<i64: 16, 128>}, {pipeline_mode = #tpu.pipeline_mode<synchronous>, transform_indices = @transform_1, window_bounds = array<i64: 128, 128>}, {pipeline_mode = #tpu.pipeline_mode<synchronous>, transform_indices = @transform_2, window_bounds = array<i64: 1, 128>}, {pipeline_mode = #tpu.pipeline_mode<synchronous>, transform_indices = @transform_3, window_bounds = array<i64: 128, 128>}, {pipeline_mode = #tpu.pipeline_mode<synchronous>, transform_indices = @transform_4, window_bounds = array<i64: 1, 128>}, {pipeline_mode = #tpu.pipeline_mode<synchronous>, transform_indices = @transform_5, window_bounds = array<i64: 128, 128>}, {pipeline_mode = #tpu.pipeline_mode<synchronous>, transform_indices = @transform_6, window_bounds = array<i64: 1, 128>}, {transform_indices = @transform_7, window_bounds = array<i64: 16, 128>}]} {
    %c0 = arith.constant 0 : index
    %c0_0 = arith.constant 0 : index
    %0 = vector.load %arg1[%c0, %c0_0] : memref<16x128xbf16, #tpu.memory_space<vmem>>, vector<16x128xbf16>
    %c0_1 = arith.constant 0 : index
    %c0_2 = arith.constant 0 : index
    %1 = vector.load %arg2[%c0_1, %c0_2] : memref<128x128xbf16, #tpu.memory_space<vmem>>, vector<128x128xbf16>
    %cst = arith.constant dense<0.000000e+00> : vector<16x128xf32>
    %2 = tpu.matmul %0, %1, %cst {dimension_numbers = #tpu.dot_dimension_numbers<[1], [0], [0], [1], [0, 0, 1, 1], [], []>} : vector<16x128xbf16>, vector<128x128xbf16>, vector<16x128xf32> -> vector<16x128xf32>
    %c0_3 = arith.constant 0 : index
    %c0_4 = arith.constant 0 : index
    %3 = vector.load %arg3[%c0_3, %c0_4] : memref<1x128xf32, #tpu.memory_space<vmem>>, vector<1x128xf32>
    %4 = vector.broadcast %3 : vector<1x128xf32> to vector<16x128xf32>
    %5 = arith.addf %2, %4 : vector<16x128xf32>
    %cst_5 = arith.constant 0.000000e+00 : f32
    %6 = vector.broadcast %cst_5 : f32 to vector<16x128xf32>
    %7 = arith.maximumf %5, %6 : vector<16x128xf32>
    %c0_6 = arith.constant 0 : index
    %c0_7 = arith.constant 0 : index
    %8 = vector.load %arg4[%c0_6, %c0_7] : memref<128x128xbf16, #tpu.memory_space<vmem>>, vector<128x128xbf16>
    %9 = arith.truncf %7 : vector<16x128xf32> to vector<16x128xbf16>
    %cst_8 = arith.constant dense<0.000000e+00> : vector<16x128xf32>
    %10 = tpu.matmul %9, %8, %cst_8 {dimension_numbers = #tpu.dot_dimension_numbers<[1], [0], [0], [1], [0, 0, 1, 1], [], []>} : vector<16x128xbf16>, vector<128x128xbf16>, vector<16x128xf32> -> vector<16x128xf32>
    %c0_9 = arith.constant 0 : index
    %c0_10 = arith.constant 0 : index
    %11 = vector.load %arg5[%c0_9, %c0_10] : memref<1x128xf32, #tpu.memory_space<vmem>>, vector<1x128xf32>
    %12 = vector.broadcast %11 : vector<1x128xf32> to vector<16x128xf32>
    %13 = arith.addf %10, %12 : vector<16x128xf32>
    %cst_11 = arith.constant 0.000000e+00 : f32
    %14 = vector.broadcast %cst_11 : f32 to vector<16x128xf32>
    %15 = arith.maximumf %13, %14 : vector<16x128xf32>
    %c0_12 = arith.constant 0 : index
    %c0_13 = arith.constant 0 : index
    %16 = vector.load %arg6[%c0_12, %c0_13] : memref<128x128xbf16, #tpu.memory_space<vmem>>, vector<128x128xbf16>
    %17 = arith.truncf %15 : vector<16x128xf32> to vector<16x128xbf16>
    %cst_14 = arith.constant dense<0.000000e+00> : vector<16x128xf32>
    %18 = tpu.matmul %17, %16, %cst_14 {dimension_numbers = #tpu.dot_dimension_numbers<[1], [0], [0], [1], [0, 0, 1, 1], [], []>} : vector<16x128xbf16>, vector<128x128xbf16>, vector<16x128xf32> -> vector<16x128xf32>
    %c0_15 = arith.constant 0 : index
    %c0_16 = arith.constant 0 : index
    %19 = vector.load %arg7[%c0_15, %c0_16] : memref<1x128xf32, #tpu.memory_space<vmem>>, vector<1x128xf32>
    %20 = vector.broadcast %19 : vector<1x128xf32> to vector<16x128xf32>
    %21 = arith.addf %18, %20 : vector<16x128xf32>
    %c0_17 = arith.constant 0 : index
    %c0_18 = arith.constant 0 : index
    %22 = vector.load %arg8[%c0_17, %c0_18] : memref<16x128xf32, #tpu.memory_space<vmem>>, vector<16x128xf32>
    tpu.vector_store %arg8[%c0_17, %c0_18], %21 {strides = array<i32>} : memref<16x128xf32, #tpu.memory_space<vmem>>, vector<16x128xf32>,
    return
  }
  func.func @transform_0(%arg0: i32) -> (i32, i32) {
    %c0_i32 = arith.constant 0 : i32
    %c0_i32_0 = arith.constant 0 : i32
    return %arg0, %c0_i32 : i32, i32
  }
  func.func @transform_1(%arg0: i32) -> (i32, i32) {
    %c0_i32 = arith.constant 0 : i32
    %c0_i32_0 = arith.constant 0 : i32
    %c0_i32_1 = arith.constant 0 : i32
    return %c0_i32, %c0_i32_0 : i32, i32
  }
  func.func @transform_2(%arg0: i32) -> (i32, i32) {
    %c0_i32 = arith.constant 0 : i32
    %c0_i32_0 = arith.constant 0 : i32
    %c0_i32_1 = arith.constant 0 : i32
    return %c0_i32, %c0_i32_0 : i32, i32
  }
  func.func @transform_3(%arg0: i32) -> (i32, i32) {
    %c0_i32 = arith.constant 0 : i32
    %c0_i32_0 = arith.constant 0 : i32
    %c0_i32_1 = arith.constant 0 : i32
    return %c0_i32, %c0_i32_0 : i32, i32
  }
  func.func @transform_4(%arg0: i32) -> (i32, i32) {
    %c0_i32 = arith.constant 0 : i32
    %c0_i32_0 = arith.constant 0 : i32
    %c0_i32_1 = arith.constant 0 : i32
    return %c0_i32, %c0_i32_0 : i32, i32
  }
  func.func @transform_5(%arg0: i32) -> (i32, i32) {
    %c0_i32 = arith.constant 0 : i32
    %c0_i32_0 = arith.constant 0 : i32
    %c0_i32_1 = arith.constant 0 : i32
    return %c0_i32, %c0_i32_0 : i32, i32
  }
  func.func @transform_6(%arg0: i32) -> (i32, i32) {
    %c0_i32 = arith.constant 0 : i32
    %c0_i32_0 = arith.constant 0 : i32
    %c0_i32_1 = arith.constant 0 : i32
    return %c0_i32, %c0_i32_0 : i32, i32
  }
  func.func @transform_7(%arg0: i32) -> (i32, i32) {
    %c0_i32 = arith.constant 0 : i32
    %c0_i32_0 = arith.constant 0 : i32
    return %arg0, %c0_i32 : i32, i32
  }
}

module attributes {stable_mosaic.version = 11 : i64} {
  func.func @_fused_stack_kernel(%arg0: i32, %arg1: memref<16x128xbf16, #tpu.memory_space<vmem>>, %arg2: memref<128x128xbf16, #tpu.memory_space<vmem>>, %arg3: memref<1x128xf32, #tpu.memory_space<vmem>>, %arg4: memref<128x128xbf16, #tpu.memory_space<vmem>>, %arg5: memref<1x128xf32, #tpu.memory_space<vmem>>, %arg6: memref<128x128xbf16, #tpu.memory_space<vmem>>, %arg7: memref<1x128xf32, #tpu.memory_space<vmem>>, %arg8: memref<16x128xf32, #tpu.memory_space<vmem>>) attributes {dimension_semantics = [#tpu.dimension_semantics<parallel>], iteration_bounds = array<i64: 1>, scalar_prefetch = 0 : i64, scratch_operands = 0 : i64, tpu.core_type = #tpu.core_type<tc>, window_params = [{transform_indices = @transform_0, window_bounds = array<i64: 16, 128>}, {pipeline_mode = #tpu.pipeline_mode<synchronous>, transform_indices = @transform_1, window_bounds = array<i64: 128, 128>}, {pipeline_mode = #tpu.pipeline_mode<synchronous>, transform_indices = @transform_2, window_bounds = array<i64: 1, 128>}, {pipeline_mode = #tpu.pipeline_mode<synchronous>, transform_indices = @transform_3, window_bounds = array<i64: 128, 128>}, {pipeline_mode = #tpu.pipeline_mode<synchronous>, transform_indices = @transform_4, window_bounds = array<i64: 1, 128>}, {pipeline_mode = #tpu.pipeline_mode<synchronous>, transform_indices = @transform_5, window_bounds = array<i64: 128, 128>}, {pipeline_mode = #tpu.pipeline_mode<synchronous>, transform_indices = @transform_6, window_bounds = array<i64: 1, 128>}, {transform_indices = @transform_7, window_bounds = array<i64: 16, 128>}]} {
    %c0 = arith.constant 0 : index
    %c0_0 = arith.constant 0 : index
    %0 = vector.load %arg1[%c0, %c0_0] : memref<16x128xbf16, #tpu.memory_space<vmem>>, vector<16x128xbf16>
    %c0_1 = arith.constant 0 : index
    %c0_2 = arith.constant 0 : index
    %1 = vector.load %arg2[%c0_1, %c0_2] : memref<128x128xbf16, #tpu.memory_space<vmem>>, vector<128x128xbf16>
    %cst = arith.constant dense<0.000000e+00> : vector<16x128xf32>
    %2 = tpu.matmul %0, %1, %cst {dimension_numbers = #tpu.dot_dimension_numbers<[1], [0], [0], [1], [0, 0, 1, 1], [], []>} : vector<16x128xbf16>, vector<128x128xbf16>, vector<16x128xf32> -> vector<16x128xf32>
    %c0_3 = arith.constant 0 : index
    %c0_4 = arith.constant 0 : index
    %3 = vector.load %arg3[%c0_3, %c0_4] : memref<1x128xf32, #tpu.memory_space<vmem>>, vector<1x128xf32>
    %4 = vector.broadcast %3 : vector<1x128xf32> to vector<16x128xf32>
    %5 = arith.addf %2, %4 : vector<16x128xf32>
    %cst_5 = arith.constant 0.000000e+00 : f32
    %6 = vector.broadcast %cst_5 : f32 to vector<16x128xf32>
    %7 = arith.maximumf %5, %6 : vector<16x128xf32>
    %c0_6 = arith.constant 0 : index
    %c0_7 = arith.constant 0 : index
    %8 = vector.load %arg4[%c0_6, %c0_7] : memref<128x128xbf16, #tpu.memory_space<vmem>>, vector<128x128xbf16>
    %9 = arith.truncf %7 : vector<16x128xf32> to vector<16x128xbf16>
    %cst_8 = arith.constant dense<0.000000e+00> : vector<16x128xf32>
    %10 = tpu.matmul %9, %8, %cst_8 {dimension_numbers = #tpu.dot_dimension_numbers<[1], [0], [0], [1], [0, 0, 1, 1], [], []>} : vector<16x128xbf16>, vector<128x128xbf16>, vector<16x128xf32> -> vector<16x128xf32>
    %c0_9 = arith.constant 0 : index
    %c0_10 = arith.constant 0 : index
    %11 = vector.load %arg5[%c0_9, %c0_10] : memref<1x128xf32, #tpu.memory_space<vmem>>, vector<1x128xf32>
    %12 = vector.broadcast %11 : vector<1x128xf32> to vector<16x128xf32>
    %13 = arith.addf %10, %12 : vector<16x128xf32>
    %cst_11 = arith.constant 0.000000e+00 : f32
    %14 = vector.broadcast %cst_11 : f32 to vector<16x128xf32>
    %15 = arith.maximumf %13, %14 : vector<16x128xf32>
    %c0_12 = arith.constant 0 : index
    %c0_13 = arith.constant 0 : index
    %16 = vector.load %arg6[%c0_12, %c0_13] : memref<128x128xbf16, #tpu.memory_space<vmem>>, vector<128x128xbf16>
    %17 = arith.truncf %15 : vector<16x128xf32> to vector<16x128xbf16>
    %cst_14 = arith.constant dense<0.000000e+00> : vector<16x128xf32>
    %18 = tpu.matmul %17, %16, %cst_14 {dimension_numbers = #tpu.dot_dimension_numbers<[1], [0], [0], [1], [0, 0, 1, 1], [], []>} : vector<16x128xbf16>, vector<128x128xbf16>, vector<16x128xf32> -> vector<16x128xf32>
    %c0_15 = arith.constant 0 : index
    %c0_16 = arith.constant 0 : index
    %19 = vector.load %arg7[%c0_15, %c0_16] : memref<1x128xf32, #tpu.memory_space<vmem>>, vector<1x128xf32>
    %20 = vector.broadcast %19 : vector<1x128xf32> to vector<16x128xf32>
    %21 = arith.addf %18, %20 : vector<16x128xf32>
    %c0_17 = arith.constant 0 : index
    %c0_18 = arith.constant 0 : index
    %22 = vector.load %arg8[%c0_17, %c0_18] : memref<16x128xf32, #tpu.memory_space<vmem>>, vector<16x128xf32>
    tpu.vector_store %arg8[%c0_17, %c0_18], %21 {strides = array<i32>} : memref<16x128xf32, #tpu.memory_space<vmem>>, vector<16x128xf32>,
    return
  }
  func.func @transform_0(%arg0: i32) -> (i32, i32) {
    %c0_i32 = arith.constant 0 : i32
    %c0_i32_0 = arith.constant 0 : i32
    return %arg0, %c0_i32 : i32, i32
  }
  func.func @transform_1(%arg0: i32) -> (i32, i32) {
    %c0_i32 = arith.constant 0 : i32
    %c0_i32_0 = arith.constant 0 : i32
    %c0_i32_1 = arith.constant 0 : i32
    return %c0_i32, %c0_i32_0 : i32, i32
  }
  func.func @transform_2(%arg0: i32) -> (i32, i32) {
    %c0_i32 = arith.constant 0 : i32
    %c0_i32_0 = arith.constant 0 : i32
    %c0_i32_1 = arith.constant 0 : i32
    return %c0_i32, %c0_i32_0 : i32, i32
  }
  func.func @transform_3(%arg0: i32) -> (i32, i32) {
    %c0_i32 = arith.constant 0 : i32
    %c0_i32_0 = arith.constant 0 : i32
    %c0_i32_1 = arith.constant 0 : i32
    return %c0_i32, %c0_i32_0 : i32, i32
  }
  func.func @transform_4(%arg0: i32) -> (i32, i32) {
    %c0_i32 = arith.constant 0 : i32
    %c0_i32_0 = arith.constant 0 : i32
    %c0_i32_1 = arith.constant 0 : i32
    return %c0_i32, %c0_i32_0 : i32, i32
  }
  func.func @transform_5(%arg0: i32) -> (i32, i32) {
    %c0_i32 = arith.constant 0 : i32
    %c0_i32_0 = arith.constant 0 : i32
    %c0_i32_1 = arith.constant 0 : i32
    return %c0_i32, %c0_i32_0 : i32, i32
  }
  func.func @transform_6(%arg0: i32) -> (i32, i32) {
    %c0_i32 = arith.constant 0 : i32
    %c0_i32_0 = arith.constant 0 : i32
    %c0_i32_1 = arith.constant 0 : i32
    return %c0_i32, %c0_i32_0 : i32, i32
  }
  func.func @transform_7(%arg0: i32) -> (i32, i32) {
    %c0_i32 = arith.constant 0 : i32
    %c0_i32_0 = arith.constant 0 : i32
    return %arg0, %c0_i32 : i32, i32
  }
}

module attributes {stable_mosaic.version = 11 : i64} {
  func.func @_tiled_linear_kernel(%arg0: i32, %arg1: i32, %arg2: i32, %arg3: memref<16x128xbf16, #tpu.memory_space<vmem>>, %arg4: memref<128x128xbf16, #tpu.memory_space<vmem>>, %arg5: memref<1x128xf32, #tpu.memory_space<vmem>>, %arg6: memref<16x128xbf16, #tpu.memory_space<vmem>>, %arg7: memref<16x128xf32, #tpu.memory_space<vmem>>) attributes {dimension_semantics = [#tpu.dimension_semantics<parallel>, #tpu.dimension_semantics<parallel>, #tpu.dimension_semantics<arbitrary>], iteration_bounds = array<i64: 1, 1, 1>, scalar_prefetch = 0 : i64, scratch_operands = 1 : i64, tpu.core_type = #tpu.core_type<tc>, window_params = [{transform_indices = @transform_0, window_bounds = array<i64: 16, 128>}, {transform_indices = @transform_1, window_bounds = array<i64: 128, 128>}, {transform_indices = @transform_2, window_bounds = array<i64: 1, 128>}, {transform_indices = @transform_3, window_bounds = array<i64: 16, 128>}]} {
    %c0_i32 = arith.constant 0 : i32
    %0 = arith.cmpi eq, %arg2, %c0_i32 : i32
    %1 = arith.extui %0 : i1 to i32
    %c0_i32_0 = arith.constant 0 : i32
    %2 = arith.cmpi ne, %1, %c0_i32_0 : i32
    scf.if %2 {
      %cst_10 = arith.constant 0.000000e+00 : f32
      %12 = vector.broadcast %cst_10 : f32 to vector<16x128xf32>
      %c0_11 = arith.constant 0 : index
      %c0_12 = arith.constant 0 : index
      %13 = vector.load %arg7[%c0_11, %c0_12] : memref<16x128xf32, #tpu.memory_space<vmem>>, vector<16x128xf32>
      tpu.vector_store %arg7[%c0_11, %c0_12], %12 {strides = array<i32>} : memref<16x128xf32, #tpu.memory_space<vmem>>, vector<16x128xf32>,
    } else {
    }
    %c0 = arith.constant 0 : index
    %c0_1 = arith.constant 0 : index
    %3 = vector.load %arg4[%c0, %c0_1] : memref<128x128xbf16, #tpu.memory_space<vmem>>, vector<128x128xbf16>
    %c0_2 = arith.constant 0 : index
    %c0_3 = arith.constant 0 : index
    %4 = vector.load %arg7[%c0_2, %c0_3] : memref<16x128xf32, #tpu.memory_space<vmem>>, vector<16x128xf32>
    %c0_4 = arith.constant 0 : index
    %c0_5 = arith.constant 0 : index
    %5 = vector.load %arg3[%c0_4, %c0_5] : memref<16x128xbf16, #tpu.memory_space<vmem>>, vector<16x128xbf16>
    %cst = arith.constant dense<0.000000e+00> : vector<16x128xf32>
    %6 = tpu.matmul %5, %3, %cst {dimension_numbers = #tpu.dot_dimension_numbers<[1], [0], [0], [1], [0, 0, 1, 1], [], []>} : vector<16x128xbf16>, vector<128x128xbf16>, vector<16x128xf32> -> vector<16x128xf32>
    %7 = arith.addf %4, %6 : vector<16x128xf32>
    %c0_6 = arith.constant 0 : index
    %c0_7 = arith.constant 0 : index
    %8 = vector.load %arg7[%c0_6, %c0_7] : memref<16x128xf32, #tpu.memory_space<vmem>>, vector<16x128xf32>
    tpu.vector_store %arg7[%c0_6, %c0_7], %7 {strides = array<i32>} : memref<16x128xf32, #tpu.memory_space<vmem>>, vector<16x128xf32>,
    %c0_i32_8 = arith.constant 0 : i32
    %9 = arith.cmpi eq, %arg2, %c0_i32_8 : i32
    %10 = arith.extui %9 : i1 to i32
    %c0_i32_9 = arith.constant 0 : i32
    %11 = arith.cmpi ne, %10, %c0_i32_9 : i32
    scf.if %11 {
      %c0_10 = arith.constant 0 : index
      %c0_11 = arith.constant 0 : index
      %12 = vector.load %arg7[%c0_10, %c0_11] : memref<16x128xf32, #tpu.memory_space<vmem>>, vector<16x128xf32>
      %c0_12 = arith.constant 0 : index
      %c0_13 = arith.constant 0 : index
      %13 = vector.load %arg5[%c0_12, %c0_13] : memref<1x128xf32, #tpu.memory_space<vmem>>, vector<1x128xf32>
      %14 = vector.broadcast %13 : vector<1x128xf32> to vector<16x128xf32>
      %15 = arith.addf %12, %14 : vector<16x128xf32>
      %cst_14 = arith.constant 0.000000e+00 : f32
      %16 = vector.broadcast %cst_14 : f32 to vector<16x128xf32>
      %17 = arith.maximumf %15, %16 : vector<16x128xf32>
      %18 = arith.truncf %17 : vector<16x128xf32> to vector<16x128xbf16>
      %c0_15 = arith.constant 0 : index
      %c0_16 = arith.constant 0 : index
      %19 = vector.load %arg6[%c0_15, %c0_16] : memref<16x128xbf16, #tpu.memory_space<vmem>>, vector<16x128xbf16>
      tpu.vector_store %arg6[%c0_15, %c0_16], %18 {strides = array<i32>} : memref<16x128xbf16, #tpu.memory_space<vmem>>, vector<16x128xbf16>,
    } else {
    }
    return
  }
  func.func @transform_0(%arg0: i32, %arg1: i32, %arg2: i32) -> (i32, i32) {
    %c0_i32 = arith.constant 0 : i32
    return %arg0, %arg2 : i32, i32
  }
  func.func @transform_1(%arg0: i32, %arg1: i32, %arg2: i32) -> (i32, i32) {
    %c0_i32 = arith.constant 0 : i32
    return %arg2, %arg1 : i32, i32
  }
  func.func @transform_2(%arg0: i32, %arg1: i32, %arg2: i32) -> (i32, i32) {
    %c0_i32 = arith.constant 0 : i32
    %c0_i32_0 = arith.constant 0 : i32
    return %c0_i32, %arg1 : i32, i32
  }
  func.func @transform_3(%arg0: i32, %arg1: i32, %arg2: i32) -> (i32, i32) {
    %c0_i32 = arith.constant 0 : i32
    return %arg0, %arg1 : i32, i32
  }
}

</mosaic_0001>

<bundles_post_ra>
// kernel: tpu_custom_call.1
= control target key start
LH: loop header
LB: loop body
LE: loop exit
PB: predicated region body
PF: predicated region fallthrough
CT: control target
= control target key end

     0   :  { %12 = vsyncpa [#allocation3], 0  ;;  %s711_s0 = inlined_call_operand.hbm [shape: bf16[16,128], index: 0, kind: input, shape index: {}]   ;;  %s712_s1 = inlined_call_operand.hbm [shape: bf16[128,128], index: 1, kind: input, shape index: {}]   ;;  %s713_s2 = inlined_call_operand.vmem [shape: f32[1,128], index: 2, kind: input, shape index: {}]   ;;  %s714_s3 = inlined_call_operand.hbm [shape: bf16[128,128], index: 3, kind: input, shape index: {}]   ;;  %s715_s4 = inlined_call_operand.vmem [shape: f32[1,128], index: 4, kind: input, shape index: {}]   ;;  %s716_s5 = inlined_call_operand.hbm [shape: bf16[128,128], index: 5, kind: input, shape index: {}]   ;;  %s717_s6 = inlined_call_operand.vmem [shape: f32[1,128], index: 6, kind: input, shape index: {}]   ;;  %s718_s7 = inlined_call_operand.hbm [shape: f32[16,128], index: 7, kind: output, shape index: {}]  }
   0x1   :  { %13 = vsyncpa [#allocation6], 0 }
   0x2   :  { %14 = vsyncpa [#allocation9], 0 }
   0x3   :  { %15 = vsyncpa [#allocation4], 0  ;;  %s33_s26 = sshll.u32 %s712_s1, 4  ;;  %s638_s27 = smov [#allocation5]   ;;  %s34_s26 = int_to_ptr.hbm [resolvable:$true] %s33_s26 }
   0x4   :  { %s35_s28 = sshll.u32 %s638_s27, 4  ;;  %s20_s8 = sshll.u32 %s711_s0, 4  ;;  %s36_s28 = int_to_ptr.vmem [resolvable:$true] %s35_s28  ;;  %s21_s8 = int_to_ptr.hbm [resolvable:$true] %s20_s8 }
   0x5   :  { %s639_s9 = smov 64   ;;  %s640_s10 = smov 4  }
   0x6   :  { %41 = dma.hbm_to_vmem [thread:$0]  %s34_s26, 1024, %s36_s28, [#allocation6], %s639_s9, %s639_s9, %s640_s10  }
   0x7   :  { %s641_s11 = smov [#allocation2]   ;;  %s48_s15 = sshll.u32 %s714_s3, 4  ;;  %s49_s15 = int_to_ptr.hbm [resolvable:$true] %s48_s15 }
   0x8   :  { %s22_s12 = sshll.u32 %s641_s11, 4  ;;  %s63_s17 = sshll.u32 %s716_s5, 4  ;;  %s23_s12 = int_to_ptr.vmem [resolvable:$true] %s22_s12  ;;  %s64_s17 = int_to_ptr.hbm [resolvable:$true] %s63_s17 }
   0x9   :  { %28 = dma.hbm_to_vmem [thread:$0]  %s21_s8, 128, %s23_s12, [#allocation3], %s639_s9, %s639_s9, %s640_s10  }
   0xa   :  { %s642_s18 = smov [#allocation7]   ;;  %s643_s0 = smov [#allocation8]  }
   0xb   :  { %s50_s19 = sshll.u32 %s642_s18, 4  ;;  %s65_s20 = sshll.u32 %s643_s0, 4  ;;  %s51_s19 = int_to_ptr.vmem [resolvable:$true] %s50_s19  ;;  %s66_s20 = int_to_ptr.vmem [resolvable:$true] %s65_s20 }
   0xc   :  { %56 = dma.hbm_to_vmem [thread:$0]  %s49_s15, 1024, %s51_s19, [#allocation6], %s639_s9, %s639_s9, %s640_s10  }
   0xd   :  { %71 = dma.hbm_to_vmem [thread:$0]  %s64_s17, 1024, %s66_s20, [#allocation9], %s639_s9, %s639_s9, %s640_s10  }
   0xe   :  { %630 = dma.done.wait [#allocation3], 128  }
   0xf   :  { %631 = vsyncadd [#allocation3], 4294967168 }
  0x10   :  { %632 = dma.done.wait [#allocation6], 2048  }
  0x11   :  { %633 = vsyncadd [#allocation6], 4294965248 }
  0x12   :  { %634 = dma.done.wait [#allocation9], 1024  }
  0x13   :  { %635 = vsyncadd [#allocation9], 4294966272  ;;  %v481_v0 = vld [vmem:[#allocation5 + $0x38] sm:$0xff]  ;;  %v480_v1 = vld [vmem:[#allocation5 + $0x30] sm:$0xff]  ;;  %s644_s24 = smov [#allocation10]   ;;  %s645_s28 = smov 128  }
  0x14   :  { %166 = vmatpush.bf16.msra.mxu0 %v481_v0  ;;  %v489_v2 = vld [vmem:[#allocation7 + $0x38] sm:$0xff]  ;;  %v488_v3 = vld [vmem:[#allocation7 + $0x30] sm:$0xff]  ;;  %v479_v4 = vld [vmem:[#allocation5 + $0x28] sm:$0xff]  ;;  %s356_s25 = sshll.u32 %s644_s24, 4  ;;  %s646_s29 = smov 8   ;;  %s357_s25 = int_to_ptr.vmem [resolvable:$true] %s356_s25 }
  0x15   :  { %251 = vmatpush.bf16.msra.mxu1 %v489_v2  ;;  %v487_v5 = vld [vmem:[#allocation7 + $0x28] sm:$0xff]  ;;  %v478_v6 = vld [vmem:[#allocation5 + $0x20] sm:$0xff]  ;;  %v477_v8 = vld [vmem:[#allocation5 + $0x18] sm:$0xff] }
  0x16   :  { %v486_v7 = vld [vmem:[#allocation7 + $0x20] sm:$0xff]  ;;  %v476_v9 = vld [vmem:[#allocation5 + $0x10] sm:$0xff]  ;;  %v475_v10 = vld [vmem:[#allocation5 + $0x8] sm:$0xff] }
  0x17   :  { %v474_v11 = vld [vmem:[#allocation5] sm:$0xff]  ;;  %v473_v12 = vld [vmem:[#allocation2] sm:$0xff]  ;;  %v484_v14 = vld [vmem:[#allocation7 + $0x10] sm:$0xff] }
  0x18   :  { %167 = vmatpush.bf16.msra.mxu0 %v480_v1  ;;  %v485_v13 = vld [vmem:[#allocation7 + $0x18] sm:$0xff]  ;;  %v483_v15 = vld [vmem:[#allocation7 + $0x8] sm:$0xff]  ;;  %v482_v16 = vld [vmem:[#allocation7] sm:$0xff] }
  0x19   :  { %252 = vmatpush.bf16.msra.mxu1 %v488_v3  ;;  %v497_v17 = vld [vmem:[#allocation8 + $0x38] sm:$0xff]  ;;  %v496_v18 = vld [vmem:[#allocation8 + $0x30] sm:$0xff]  ;;  %v495_v19 = vld [vmem:[#allocation8 + $0x28] sm:$0xff] }
  0x1a   :  { %336 = vmatpush.bf16.msra.mxu2 %v497_v17  ;;  %v494_v20 = vld [vmem:[#allocation8 + $0x20] sm:$0xff]  ;;  %v507_v22 = vld [vmem:[%s713_s2] ss:$0 sm:$0xff]  ;;  %v492_v30 = vld [vmem:[#allocation8 + $0x10] sm:$0xff] }
  0x1b   :  { %v493_v29 = vld [vmem:[#allocation8 + $0x18] sm:$0xff]  ;;  %v491_v31 = vld [vmem:[#allocation8 + $0x8] sm:$0xff]  ;;  %v490_v32 = vld [vmem:[#allocation8] sm:$0xff] }
  0x1c   :  { %168 = vmatpush.bf16.msra.mxu0 %v479_v4  ;;  %v508_v34 = vld [vmem:[%s715_s4] ss:$0 sm:$0xff]  ;;  %s358_s4 = sshll.u32 %s718_s7, 4  ;;  %s359_s4 = int_to_ptr.hbm [resolvable:$true] %s358_s4 }
  0x1d   :  { %253 = vmatpush.bf16.msra.mxu1 %v487_v5  ;;  %v509_v41 = vld [vmem:[%s717_s6] ss:$0 sm:$0xff] }
  0x1e   :  { %337 = vmatpush.bf16.msra.mxu2 %v496_v18 }
  0x20   :  { %169 = vmatpush.bf16.msra.mxu0 %v478_v6 }
  0x21   :  { %254 = vmatpush.bf16.msra.mxu1 %v486_v7 }
  0x22   :  { %338 = vmatpush.bf16.msra.mxu2 %v495_v19 }
  0x24   :  { %170 = vmatpush.bf16.msra.mxu0 %v477_v8 }
  0x25   :  { %255 = vmatpush.bf16.msra.mxu1 %v485_v13 }
  0x26   :  { %339 = vmatpush.bf16.msra.mxu2 %v494_v20 }
  0x28   :  { %171 = vmatpush.bf16.msra.mxu0 %v476_v9 }
  0x29   :  { %256 = vmatpush.bf16.msra.mxu1 %v484_v14 }
  0x2a   :  { %340 = vmatpush.bf16.msra.mxu2 %v493_v29 }
  0x2c   :  { %172 = vmatpush.bf16.msra.mxu0 %v475_v10 }
  0x2d   :  { %257 = vmatpush.bf16.msra.mxu1 %v483_v15 }
  0x2e   :  { %341 = vmatpush.bf16.msra.mxu2 %v492_v30 }
  0x30   :  { %173 = vmatpush.bf16.msra.mxu0 %v474_v11 }
  0x31   :  { %258 = vmatpush.bf16.msra.mxu1 %v482_v16 }
  0x32   :  { %342 = vmatpush.bf16.msra.mxu2 %v491_v31 }
  0x33   :  { %174 = vmatmul.bf16.vlgmr.msra.gmra.mxu0 %v473_v12 }
  0x36   :  { %343 = vmatpush.bf16.msra.mxu2 %v490_v32 }
  0xb0   :  { %v175_v21 = vpop.f32.mrf.mxu0 }
  0xb1   :  { %v176_v23 = vadd.f32 %v507_v22, %v175_v21 }
  0xb3   :  { %v180_v26 = vmax.f32 %v176_v23, 0.0 }
  0xb8   :  { %v177_v24 = vpop.f32.mrf.mxu0 }
  0xb9   :  { %v178_v25 = vadd.f32 %v507_v22, %v177_v24 }
  0xbb   :  { %v181_v27 = vmax.f32 %v178_v25, 0.0 }
  0xbd   :  { %v198_v28 = vpack.c.bf16 %v181_v27, %v180_v26 }
  0xbf   :  { %259 = vmatmul.bf16.vlgmr.msra.gmra.mxu1 %v198_v28 }
 0x13c   :  { %v260_v33 = vpop.f32.mrf.mxu1 }
 0x13d   :  { %v261_v35 = vadd.f32 %v508_v34, %v260_v33 }
 0x13f   :  { %v265_v38 = vmax.f32 %v261_v35, 0.0 }
 0x144   :  { %v262_v36 = vpop.f32.mrf.mxu1 }
 0x145   :  { %v263_v37 = vadd.f32 %v508_v34, %v262_v36 }
 0x147   :  { %v266_v39 = vmax.f32 %v263_v37, 0.0 }
 0x149   :  { %v283_v40 = vpack.c.bf16 %v266_v39, %v265_v38 }
 0x14b   :  { %344 = vmatmul.bf16.vlgmr.msra.gmra.mxu2 %v283_v40 }
 0x1ce   :  { %v345_v42 = vpop.f32.mrf.mxu2 }
 0x1cf   :  { %v346_v43 = vadd.f32 %v509_v41, %v345_v42 }
 0x1d1   :  { %350 = vst [vmem:[#allocation10] sm:$0xff] %v346_v43 }
 0x1d6   :  { %v347_v44 = vpop.f32.mrf.mxu2 }
 0x1d7   :  { %v348_v45 = vadd.f32 %v509_v41, %v347_v44 }
 0x1d9   :  { %351 = vst [vmem:[#allocation10 + $0x8] sm:$0xff] %v348_v45 }
 0x1da   :  { %364 = dma.vmem_to_hbm [thread:$0]  %s357_s25, 256, %s359_s4, [#allocation4], %s645_s28, %s645_s28, %s646_s29  }
 0x1db   :  { %636 = dma.done.wait [#allocation4], 256  }
 0x1dc   :  { %637 = vsyncadd [#allocation4], 4294967040 }
 0x1dd   :  { %369 = vsyncpa [#allocation3], 1 }
 0x1de   :  { %370 = vsyncpa [#allocation6], 1 }
 0x1df   :  { %371 = vsyncpa [#allocation9], 1 }
 0x1e0   :  { %372 = vsyncpa [#allocation4], 1 }

// kernel: tpu_custom_call.1
= control target key start
LH: loop header
LB: loop body
LE: loop exit
PB: predicated region body
PF: predicated region fallthrough
CT: control target
= control target key end

     0   :  { %12 = vsyncpa [#allocation3], 0  ;;  %s711_s0 = inlined_call_operand.hbm [shape: bf16[16,128], index: 0, kind: input, shape index: {}]   ;;  %s712_s1 = inlined_call_operand.hbm [shape: bf16[128,128], index: 1, kind: input, shape index: {}]   ;;  %s713_s2 = inlined_call_operand.vmem [shape: f32[1,128], index: 2, kind: input, shape index: {}]   ;;  %s714_s3 = inlined_call_operand.hbm [shape: bf16[128,128], index: 3, kind: input, shape index: {}]   ;;  %s715_s4 = inlined_call_operand.vmem [shape: f32[1,128], index: 4, kind: input, shape index: {}]   ;;  %s716_s5 = inlined_call_operand.hbm [shape: bf16[128,128], index: 5, kind: input, shape index: {}]   ;;  %s717_s6 = inlined_call_operand.vmem [shape: f32[1,128], index: 6, kind: input, shape index: {}]   ;;  %s718_s7 = inlined_call_operand.hbm [shape: f32[16,128], index: 7, kind: output, shape index: {}]  }
   0x1   :  { %13 = vsyncpa [#allocation6], 0 }
   0x2   :  { %14 = vsyncpa [#allocation9], 0 }
   0x3   :  { %15 = vsyncpa [#allocation4], 0  ;;  %s33_s26 = sshll.u32 %s712_s1, 4  ;;  %s638_s27 = smov [#allocation5]   ;;  %s34_s26 = int_to_ptr.hbm [resolvable:$true] %s33_s26 }
   0x4   :  { %s35_s28 = sshll.u32 %s638_s27, 4  ;;  %s20_s8 = sshll.u32 %s711_s0, 4  ;;  %s36_s28 = int_to_ptr.vmem [resolvable:$true] %s35_s28  ;;  %s21_s8 = int_to_ptr.hbm [resolvable:$true] %s20_s8 }
   0x5   :  { %s639_s9 = smov 64   ;;  %s640_s10 = smov 4  }
   0x6   :  { %41 = dma.hbm_to_vmem [thread:$0]  %s34_s26, 1024, %s36_s28, [#allocation6], %s639_s9, %s639_s9, %s640_s10  }
   0x7   :  { %s641_s11 = smov [#allocation2]   ;;  %s48_s15 = sshll.u32 %s714_s3, 4  ;;  %s49_s15 = int_to_ptr.hbm [resolvable:$true] %s48_s15 }
   0x8   :  { %s22_s12 = sshll.u32 %s641_s11, 4  ;;  %s63_s17 = sshll.u32 %s716_s5, 4  ;;  %s23_s12 = int_to_ptr.vmem [resolvable:$true] %s22_s12  ;;  %s64_s17 = int_to_ptr.hbm [resolvable:$true] %s63_s17 }
   0x9   :  { %28 = dma.hbm_to_vmem [thread:$0]  %s21_s8, 128, %s23_s12, [#allocation3], %s639_s9, %s639_s9, %s640_s10  }
   0xa   :  { %s642_s18 = smov [#allocation7]   ;;  %s643_s0 = smov [#allocation8]  }
   0xb   :  { %s50_s19 = sshll.u32 %s642_s18, 4  ;;  %s65_s20 = sshll.u32 %s643_s0, 4  ;;  %s51_s19 = int_to_ptr.vmem [resolvable:$true] %s50_s19  ;;  %s66_s20 = int_to_ptr.vmem [resolvable:$true] %s65_s20 }
   0xc   :  { %56 = dma.hbm_to_vmem [thread:$0]  %s49_s15, 1024, %s51_s19, [#allocation6], %s639_s9, %s639_s9, %s640_s10  }
   0xd   :  { %71 = dma.hbm_to_vmem [thread:$0]  %s64_s17, 1024, %s66_s20, [#allocation9], %s639_s9, %s639_s9, %s640_s10  }
   0xe   :  { %630 = dma.done.wait [#allocation3], 128  }
   0xf   :  { %631 = vsyncadd [#allocation3], 4294967168 }
  0x10   :  { %632 = dma.done.wait [#allocation6], 2048  }
  0x11   :  { %633 = vsyncadd [#allocation6], 4294965248 }
  0x12   :  { %634 = dma.done.wait [#allocation9], 1024  }
  0x13   :  { %635 = vsyncadd [#allocation9], 4294966272  ;;  %v481_v0 = vld [vmem:[#allocation5 + $0x38] sm:$0xff]  ;;  %v480_v1 = vld [vmem:[#allocation5 + $0x30] sm:$0xff]  ;;  %s644_s24 = smov [#allocation10]   ;;  %s645_s28 = smov 128  }
  0x14   :  { %166 = vmatpush.bf16.msra.mxu0 %v481_v0  ;;  %v489_v2 = vld [vmem:[#allocation7 + $0x38] sm:$0xff]  ;;  %v488_v3 = vld [vmem:[#allocation7 + $0x30] sm:$0xff]  ;;  %v479_v4 = vld [vmem:[#allocation5 + $0x28] sm:$0xff]  ;;  %s356_s25 = sshll.u32 %s644_s24, 4  ;;  %s646_s29 = smov 8   ;;  %s357_s25 = int_to_ptr.vmem [resolvable:$true] %s356_s25 }
  0x15   :  { %251 = vmatpush.bf16.msra.mxu1 %v489_v2  ;;  %v487_v5 = vld [vmem:[#allocation7 + $0x28] sm:$0xff]  ;;  %v478_v6 = vld [vmem:[#allocation5 + $0x20] sm:$0xff]  ;;  %v477_v8 = vld [vmem:[#allocation5 + $0x18] sm:$0xff] }
  0x16   :  { %v486_v7 = vld [vmem:[#allocation7 + $0x20] sm:$0xff]  ;;  %v476_v9 = vld [vmem:[#allocation5 + $0x10] sm:$0xff]  ;;  %v475_v10 = vld [vmem:[#allocation5 + $0x8] sm:$0xff] }
  0x17   :  { %v474_v11 = vld [vmem:[#allocation5] sm:$0xff]  ;;  %v473_v12 = vld [vmem:[#allocation2] sm:$0xff]  ;;  %v484_v14 = vld [vmem:[#allocation7 + $0x10] sm:$0xff] }
  0x18   :  { %167 = vmatpush.bf16.msra.mxu0 %v480_v1  ;;  %v485_v13 = vld [vmem:[#allocation7 + $0x18] sm:$0xff]  ;;  %v483_v15 = vld [vmem:[#allocation7 + $0x8] sm:$0xff]  ;;  %v482_v16 = vld [vmem:[#allocation7] sm:$0xff] }
  0x19   :  { %252 = vmatpush.bf16.msra.mxu1 %v488_v3  ;;  %v497_v17 = vld [vmem:[#allocation8 + $0x38] sm:$0xff]  ;;  %v496_v18 = vld [vmem:[#allocation8 + $0x30] sm:$0xff]  ;;  %v495_v19 = vld [vmem:[#allocation8 + $0x28] sm:$0xff] }
  0x1a   :  { %336 = vmatpush.bf16.msra.mxu2 %v497_v17  ;;  %v494_v20 = vld [vmem:[#allocation8 + $0x20] sm:$0xff]  ;;  %v507_v22 = vld [vmem:[%s713_s2] ss:$0 sm:$0xff]  ;;  %v492_v30 = vld [vmem:[#allocation8 + $0x10] sm:$0xff] }
  0x1b   :  { %v493_v29 = vld [vmem:[#allocation8 + $0x18] sm:$0xff]  ;;  %v491_v31 = vld [vmem:[#allocation8 + $0x8] sm:$0xff]  ;;  %v490_v32 = vld [vmem:[#allocation8] sm:$0xff] }
  0x1c   :  { %168 = vmatpush.bf16.msra.mxu0 %v479_v4  ;;  %v508_v34 = vld [vmem:[%s715_s4] ss:$0 sm:$0xff]  ;;  %s358_s4 = sshll.u32 %s718_s7, 4  ;;  %s359_s4 = int_to_ptr.hbm [resolvable:$true] %s358_s4 }
  0x1d   :  { %253 = vmatpush.bf16.msra.mxu1 %v487_v5  ;;  %v509_v41 = vld [vmem:[%s717_s6] ss:$0 sm:$0xff] }
  0x1e   :  { %337 = vmatpush.bf16.msra.mxu2 %v496_v18 }
  0x20   :  { %169 = vmatpush.bf16.msra.mxu0 %v478_v6 }
  0x21   :  { %254 = vmatpush.bf16.msra.mxu1 %v486_v7 }
  0x22   :  { %338 = vmatpush.bf16.msra.mxu2 %v495_v19 }
  0x24   :  { %170 = vmatpush.bf16.msra.mxu0 %v477_v8 }
  0x25   :  { %255 = vmatpush.bf16.msra.mxu1 %v485_v13 }
  0x26   :  { %339 = vmatpush.bf16.msra.mxu2 %v494_v20 }
  0x28   :  { %171 = vmatpush.bf16.msra.mxu0 %v476_v9 }
  0x29   :  { %256 = vmatpush.bf16.msra.mxu1 %v484_v14 }
  0x2a   :  { %340 = vmatpush.bf16.msra.mxu2 %v493_v29 }
  0x2c   :  { %172 = vmatpush.bf16.msra.mxu0 %v475_v10 }
  0x2d   :  { %257 = vmatpush.bf16.msra.mxu1 %v483_v15 }
  0x2e   :  { %341 = vmatpush.bf16.msra.mxu2 %v492_v30 }
  0x30   :  { %173 = vmatpush.bf16.msra.mxu0 %v474_v11 }
  0x31   :  { %258 = vmatpush.bf16.msra.mxu1 %v482_v16 }
  0x32   :  { %342 = vmatpush.bf16.msra.mxu2 %v491_v31 }
  0x33   :  { %174 = vmatmul.bf16.vlgmr.msra.gmra.mxu0 %v473_v12 }
  0x36   :  { %343 = vmatpush.bf16.msra.mxu2 %v490_v32 }
  0xb0   :  { %v175_v21 = vpop.f32.mrf.mxu0 }
  0xb1   :  { %v176_v23 = vadd.f32 %v507_v22, %v175_v21 }
  0xb3   :  { %v180_v26 = vmax.f32 %v176_v23, 0.0 }
  0xb8   :  { %v177_v24 = vpop.f32.mrf.mxu0 }
  0xb9   :  { %v178_v25 = vadd.f32 %v507_v22, %v177_v24 }
  0xbb   :  { %v181_v27 = vmax.f32 %v178_v25, 0.0 }
  0xbd   :  { %v198_v28 = vpack.c.bf16 %v181_v27, %v180_v26 }
  0xbf   :  { %259 = vmatmul.bf16.vlgmr.msra.gmra.mxu1 %v198_v28 }
 0x13c   :  { %v260_v33 = vpop.f32.mrf.mxu1 }
 0x13d   :  { %v261_v35 = vadd.f32 %v508_v34, %v260_v33 }
 0x13f   :  { %v265_v38 = vmax.f32 %v261_v35, 0.0 }
 0x144   :  { %v262_v36 = vpop.f32.mrf.mxu1 }
 0x145   :  { %v263_v37 = vadd.f32 %v508_v34, %v262_v36 }
 0x147   :  { %v266_v39 = vmax.f32 %v263_v37, 0.0 }
 0x149   :  { %v283_v40 = vpack.c.bf16 %v266_v39, %v265_v38 }
 0x14b   :  { %344 = vmatmul.bf16.vlgmr.msra.gmra.mxu2 %v283_v40 }
 0x1ce   :  { %v345_v42 = vpop.f32.mrf.mxu2 }
 0x1cf   :  { %v346_v43 = vadd.f32 %v509_v41, %v345_v42 }
 0x1d1   :  { %350 = vst [vmem:[#allocation10] sm:$0xff] %v346_v43 }
 0x1d6   :  { %v347_v44 = vpop.f32.mrf.mxu2 }
 0x1d7   :  { %v348_v45 = vadd.f32 %v509_v41, %v347_v44 }
 0x1d9   :  { %351 = vst [vmem:[#allocation10 + $0x8] sm:$0xff] %v348_v45 }
 0x1da   :  { %364 = dma.vmem_to_hbm [thread:$0]  %s357_s25, 256, %s359_s4, [#allocation4], %s645_s28, %s645_s28, %s646_s29  }
 0x1db   :  { %636 = dma.done.wait [#allocation4], 256  }
 0x1dc   :  { %637 = vsyncadd [#allocation4], 4294967040 }
 0x1dd   :  { %369 = vsyncpa [#allocation3], 1 }
 0x1de   :  { %370 = vsyncpa [#allocation6], 1 }
 0x1df   :  { %371 = vsyncpa [#allocation9], 1 }
 0x1e0   :  { %372 = vsyncpa [#allocation4], 1 }

// kernel: tpu_custom_call.1
= control target key start
LH: loop header
LB: loop body
LE: loop exit
PB: predicated region body
PF: predicated region fallthrough
CT: control target
= control target key end

     0   :  { %8 = vsyncpa [#allocation4], 0  ;;  %s362_s0 = inlined_call_operand.hbm [shape: bf16[16,128], index: 0, kind: input, shape index: {}]   ;;  %s363_s1 = inlined_call_operand.hbm [shape: bf16[128,128], index: 1, kind: input, shape index: {}]   ;;  %s364_s2 = inlined_call_operand.vmem [shape: f32[1,128], index: 2, kind: input, shape index: {}]   ;;  %s365_s3 = inlined_call_operand.hbm [shape: bf16[16,128], index: 3, kind: output, shape index: {}]  }
   0x1   :  { %9 = vsyncpa [#allocation7], 0 }
   0x2   :  { %10 = vsyncpa [#allocation5], 0  ;;  %s15_s14 = sshll.u32 %s362_s0, 4  ;;  %s316_s15 = smov [#allocation3]   ;;  %s16_s14 = int_to_ptr.hbm [resolvable:$true] %s15_s14 }
   0x3   :  { %s17_s16 = sshll.u32 %s316_s15, 4  ;;  %s28_s19 = sshll.u32 %s363_s1, 4  ;;  %s18_s16 = int_to_ptr.vmem [resolvable:$true] %s17_s16  ;;  %s29_s19 = int_to_ptr.hbm [resolvable:$true] %s28_s19 }
   0x4   :  { %s317_s20 = smov 64   ;;  %s318_s21 = smov 4  }
   0x5   :  { %23 = dma.hbm_to_vmem [thread:$0]  %s16_s14, 128, %s18_s16, [#allocation4], %s317_s20, %s317_s20, %s318_s21  }
   0x6   :  { %s319_s22 = smov [#allocation6]  }
   0x7   :  { %s30_s23 = sshll.u32 %s319_s22, 4  ;;  %s31_s23 = int_to_ptr.vmem [resolvable:$true] %s30_s23 }
   0x8   :  { %36 = dma.hbm_to_vmem [thread:$0]  %s29_s19, 1024, %s31_s23, [#allocation7], %s317_s20, %s317_s20, %s318_s21  }
   0x9   :  { %310 = dma.done.wait [#allocation4], 128  }
   0xa   :  { %311 = vsyncadd [#allocation4], 4294967168 }
   0xb   :  { %312 = dma.done.wait [#allocation7], 1024  }
   0xc   :  { %313 = vsyncadd [#allocation7], 4294966272  ;;  %v225_v0 = vld [vmem:[#allocation6 + $0x38] sm:$0xff]  ;;  %v224_v1 = vld [vmem:[#allocation6 + $0x30] sm:$0xff]  ;;  %s320_s24 = smov [#allocation8]   ;;  %s168_s28 = sshll.u32 %s365_s3, 4  ;;  %s169_s28 = int_to_ptr.hbm [resolvable:$true] %s168_s28 }
   0xd   :  { %127 = vmatpush.bf16.msra.mxu0 %v225_v0  ;;  %v223_v2 = vld [vmem:[#allocation6 + $0x28] sm:$0xff]  ;;  %v222_v3 = vld [vmem:[#allocation6 + $0x20] sm:$0xff]  ;;  %v221_v4 = vld [vmem:[#allocation6 + $0x18] sm:$0xff]  ;;  %s166_s25 = sshll.u32 %s320_s24, 4  ;;  %s167_s25 = int_to_ptr.vmem [resolvable:$true] %s166_s25 }
   0xe   :  { %v220_v5 = vld [vmem:[#allocation6 + $0x10] sm:$0xff]  ;;  %v219_v6 = vld [vmem:[#allocation6 + $0x8] sm:$0xff]  ;;  %v218_v7 = vld [vmem:[#allocation6] sm:$0xff] }
   0xf   :  { %v226_v8 = vld [vmem:[#allocation3] sm:$0xff] }
  0x10   :  { %v237_v10 = vld [vmem:[%s364_s2] ss:$0 sm:$0xff] }
  0x11   :  { %128 = vmatpush.bf16.msra.mxu0 %v224_v1 }
  0x15   :  { %129 = vmatpush.bf16.msra.mxu0 %v223_v2 }
  0x19   :  { %130 = vmatpush.bf16.msra.mxu0 %v222_v3 }
  0x1d   :  { %131 = vmatpush.bf16.msra.mxu0 %v221_v4 }
  0x21   :  { %132 = vmatpush.bf16.msra.mxu0 %v220_v5 }
  0x25   :  { %133 = vmatpush.bf16.msra.mxu0 %v219_v6 }
  0x29   :  { %134 = vmatpush.bf16.msra.mxu0 %v218_v7 }
  0x2c   :  { %135 = vmatmul.bf16.vlgmr.msra.gmra.mxu0 %v226_v8 }
  0xa9   :  { %v136_v9 = vpop.f32.mrf.mxu0 }
  0xaa   :  { %v154_v11 = vadd.f32 %v237_v10, %v136_v9 }
  0xac   :  { %v156_v14 = vmax.f32 %v154_v11, 0.0 }
  0xb1   :  { %v138_v12 = vpop.f32.mrf.mxu0 }
  0xb2   :  { %v155_v13 = vadd.f32 %v237_v10, %v138_v12 }
  0xb4   :  { %v157_v15 = vmax.f32 %v155_v13, 0.0 }
  0xb6   :  { %v230_v16 = vpack.c.bf16 %v157_v15, %v156_v14 }
  0xb8   :  { %231 = vst [vmem:[#allocation8] sm:$0xff] %v230_v16  }
  0xb9   :  { %174 = dma.vmem_to_hbm [thread:$0]  %s167_s25, 128, %s169_s28, [#allocation5], %s317_s20, %s317_s20, %s318_s21  }
  0xba   :  { %314 = dma.done.wait [#allocation5], 128  }
  0xbb   :  { %315 = vsyncadd [#allocation5], 4294967168 }
  0xbc   :  { %179 = vsyncpa [#allocation4], 1 }
  0xbd   :  { %180 = vsyncpa [#allocation7], 1 }
  0xbe   :  { %181 = vsyncpa [#allocation5], 1 }

</bundles_post_ra>
